<compile_context>
chip_gen: v6e
topology: v6e:2x2x1
jax: 0.10.0
libtpu: 0.0.40
codegen_flags: <defaults>
</compile_context>

<pallas_src>
import jax
import jax.numpy as jnp
from jax import lax
from jax.experimental import pallas as pl
from jax.experimental.pallas import tpu as pltpu

EPS = 1e-5


def _round_up(x, m):
    return (x + m - 1) // m * m


# -------------------------------- Pallas kernel --------------------------------

def conv_matmul_stats_kernel(x_ref, w_ref, y_ref, s_ref):
    """One M-tile of conv-as-matmul plus BN partial statistics.

    x_ref: (TM, KP)  bf16  im2col'd activation tile (K = 9*C, zero-padded to KP)
    w_ref: (KP, CP)  bf16  packed 3x3 weights (zero-padded rows/cols)
    y_ref: (TM, CP)  f32   pre-BN conv output tile
    s_ref: (1, 8, CP) f32  row 0 = sum(y), row 1 = sum(y*y), rows 2..7 = 0
    """
    y = jnp.dot(x_ref[...], w_ref[...], preferred_element_type=jnp.float32)
    y_ref[...] = y
    cp = y.shape[1]
    ssum = jnp.sum(y, axis=0, keepdims=True)
    ssq = jnp.sum(y * y, axis=0, keepdims=True)
    pad = jnp.zeros((6, cp), jnp.float32)
    # Single sublane-aligned (8, CP) store instead of two masked (1, CP) stores.
    s_ref[...] = jnp.concatenate([ssum, ssq, pad], axis=0).reshape(1, 8, cp)


# ------------------------------- wrapper helpers --------------------------------

def _pack_weight(w_oihw, kp, cp):
    """PyTorch (Cout, Cin, 3, 3) -> dense (9*Cin, Cout), zero-padded to (kp, cp), bf16."""
    cout, cin = w_oihw.shape[0], w_oihw.shape[1]
    w = jnp.transpose(w_oihw.astype(jnp.float32), (2, 3, 1, 0)).reshape(9 * cin, cout)
    w = jnp.pad(w, ((0, kp - 9 * cin), (0, cp - cout)))
    return w.astype(jnp.bfloat16)


def _im2col_3x3(x_nhwc, kp, mp):
    """Same-padded 3x3 patch extraction -> (mp, kp) bf16, tap-major / channel-minor.

    Runs in XLA on the dense-channel activation; fuses with preceding elementwise ops.
    Zero-padded rows (M padding) contribute 0 to both BN sums, so stats stay exact.
    """
    n, h, w, c = x_nhwc.shape
    xp = jnp.pad(x_nhwc, ((0, 0), (1, 1), (1, 1), (0, 0)))
    taps = [xp[:, dy:dy + h, dx:dx + w, :] for dy in range(3) for dx in range(3)]
    col = jnp.concatenate(taps, axis=-1).reshape(n * h * w, 9 * c)
    col = jnp.pad(col, ((0, mp - n * h * w), (0, kp - 9 * c)))
    return col.astype(jnp.bfloat16)


def _vmem_limit_bytes(working_set_bytes):
    cap = 32 << 20                                   # v7x-safe (64 MiB/TC physical)
    try:
        cap = min(cap, int(pltpu.get_tpu_info().vmem_capacity_bytes) // 2)
    except Exception:
        pass
    return int(min(cap, max(16 << 20, 4 * working_set_bytes)))


def _conv_pass(xcol, w_packed, tile_m, kp, cp):
    mp = xcol.shape[0]
    n_tiles = mp // tile_m
    working_set = (2 * tile_m * kp * 2          # xcol tile, double-buffered, bf16
                   + 2 * kp * cp * 2            # weight (resident), bf16
                   + 2 * tile_m * cp * 4        # y tile, double-buffered, f32
                   + 3 * tile_m * cp * 4        # in-kernel temporaries (y, y*y)
                   + 2 * 8 * cp * 4)            # stats tile
    return pl.pallas_call(
        conv_matmul_stats_kernel,
        grid=(n_tiles,),
        in_specs=[pl.BlockSpec((tile_m, kp), lambda m: (m, 0)),
                  pl.BlockSpec((kp, cp), lambda m: (0, 0))],      # weight stays resident
        out_specs=(pl.BlockSpec((tile_m, cp), lambda m: (m, 0)),
                   pl.BlockSpec((1, 8, cp), lambda m: (m, 0, 0))),
        out_shape=(jax.ShapeDtypeStruct((mp, cp), jnp.float32),
                   jax.ShapeDtypeStruct((n_tiles, 8, cp), jnp.float32)),
        compiler_params=pltpu.CompilerParams(
            dimension_semantics=("parallel",),                    # independent M tiles
            vmem_limit_bytes=_vmem_limit_bytes(working_set)),
    )(xcol, w_packed)


def _finalize_bn(stats, gamma, beta, count, c):
    tot = jnp.sum(stats, axis=0)                                  # (8, CP)
    mean = tot[0, :c] / count
    var = jnp.maximum(tot[1, :c] / count - mean * mean, 0.0)
    scale = gamma * lax.rsqrt(var + EPS)
    shift = beta - mean * scale
    return scale, shift


# ---------------------------------- forward -------------------------------------

def residual_block_pallas(x_nchw, params):
    """x_nchw: (N, C, H, W) float32. Returns (N, C, H, W)."""
    n, c, h, w = x_nchw.shape
    kp = _round_up(9 * c, 128)                  # dense contraction, padded once to lanes
    cp = _round_up(c, 128)                      # lane-dense output channels
    m = n * h * w
    # Aim for ~8 grid steps (pipeline depth + both v7x TCs busy); bigger tiles for
    # bigger images so the MXU sees a larger M per step.
    tile_m = max(128, min(512, _round_up(max(m // 8, 1), 128)))
    mp = _round_up(m, tile_m)
    count = float(m)

    x = jnp.transpose(x_nchw, (0, 2, 3, 1)).astype(jnp.float32)   # NHWC, dense channels

    w1 = _pack_weight(params["w1"], kp, cp)
    w2 = _pack_weight(params["w2"], kp, cp)
    # Conv biases b1/b2 intentionally dropped: cancelled exactly by training-mode BN.
    g1, be1 = params["g1"].astype(jnp.float32), params["be1"].astype(jnp.float32)
    g2, be2 = params["g2"].astype(jnp.float32), params["be2"].astype(jnp.float32)

    # Pass 1: conv1 (one bf16 matmul per tile) + BN1 partial stats.
    y1, s1 = _conv_pass(_im2col_3x3(x, kp, mp), w1, tile_m, kp, cp)
    sc1, sh1 = _finalize_bn(s1, g1, be1, count, c)

    # XLA glue (fuses with the im2col that feeds conv2): BN1 scale/shift + ReLU.
    z = jnp.maximum(y1[:m, :c] * sc1[None, :] + sh1[None, :], 0.0).reshape(n, h, w, c)

    # Pass 2: conv2 + BN2 partial stats.
    y2, s2 = _conv_pass(_im2col_3x3(z, kp, mp), w2, tile_m, kp, cp)
    sc2, sh2 = _finalize_bn(s2, g2, be2, count, c)

    # Epilogue (was Pallas pass 3): BN2 apply + residual + crop + NCHW transpose in XLA.
    out = (y2[:m, :c] * sc2[None, :] + sh2[None, :]).reshape(n, h, w, c) + x
    return jnp.transpose(out, (0, 3, 1, 2))


# --------------------------------- reference ------------------------------------

def residual_block_reference(x_nchw, params):
    """Pure-JAX f32 reference mirroring the PyTorch forward (conv WITH bias, 2-pass BN)."""
    def conv(x, w, b):
        y = lax.conv_general_dilated(x, w, window_strides=(1, 1),
                                     padding=((1, 1), (1, 1)),
                                     dimension_numbers=("NCHW", "OIHW", "NCHW"))
        return y + b[None, :, None, None]

    def bn(x, g, be):
        mean = jnp.mean(x, axis=(0, 2, 3), keepdims=True)
        var = jnp.mean((x - mean) ** 2, axis=(0, 2, 3), keepdims=True)
        return (x - mean) * lax.rsqrt(var + EPS) * g[None, :, None, None] \
            + be[None, :, None, None]

    y = jax.nn.relu(bn(conv(x_nchw, params["w1"], params["b1"]), params["g1"], params["be1"]))
    z = bn(conv(y, params["w2"], params["b2"]), params["g2"], params["be2"])
    return z + x_nchw


def make_params(key, channels):
    k1, k2, k3, k4 = jax.random.split(key, 4)
    scale = 1.0 / (channels * 9) ** 0.5
    return {
        "w1": jax.random.normal(k1, (channels, channels, 3, 3), jnp.float32) * scale,
        "b1": jax.random.normal(k2, (channels,), jnp.float32) * 0.1,
        "w2": jax.random.normal(k3, (channels, channels, 3, 3), jnp.float32) * scale,
        "b2": jax.random.normal(k4, (channels,), jnp.float32) * 0.1,
        "g1": jnp.ones((channels,), jnp.float32),
        "be1": jnp.zeros((channels,), jnp.float32),
        "g2": jnp.ones((channels,), jnp.float32),
        "be2": jnp.zeros((channels,), jnp.float32),
    }


if __name__ == "__main__":
    key = jax.random.PRNGKey(0)
    kx, kparam = jax.random.split(key)

    N, C, H, W = 2, 8, 16, 16        # in_channels == out_channels (required by residual)
    x = jax.random.normal(kx, (N, C, H, W), jnp.float32)
    params = make_params(kparam, C)

    fwd = jax.jit(residual_block_pallas)
    out = jax.block_until_ready(fwd(x, params))
    ref = jax.block_until_ready(residual_block_reference(x, params))

    assert out.shape == (N, C, H, W)
    max_err = float(jnp.max(jnp.abs(out - ref)))
    rel_err = float(jnp.linalg.norm(out - ref) / (jnp.linalg.norm(ref) + 1e-12))
    # bf16 MXU operands with f32 accumulation: expect ~1e-3 relative error vs f32 ref.
    assert max_err < 7.5e-2 and rel_err < 2e-2, f"max_abs={max_err}, rel_l2={rel_err}"
    print("KERNEL_OK")
</pallas_src>

<mosaic_0001>
module attributes {stable_mosaic.version = 11 : i64} {
  func.func @conv_matmul_stats_kernel(%arg0: i32, %arg1: memref<128x128xbf16, #tpu.memory_space<vmem>>, %arg2: memref<128x128xbf16, #tpu.memory_space<vmem>>, %arg3: memref<128x128xf32, #tpu.memory_space<vmem>>, %arg4: memref<1x8x128xf32, #tpu.memory_space<vmem>>) attributes {dimension_semantics = [#tpu.dimension_semantics<parallel>], iteration_bounds = array<i64: 4>, scalar_prefetch = 0 : i64, scratch_operands = 0 : i64, tpu.core_type = #tpu.core_type<tc>, window_params = [{transform_indices = @transform_0, window_bounds = array<i64: 128, 128>}, {pipeline_mode = #tpu.pipeline_mode<synchronous>, transform_indices = @transform_1, window_bounds = array<i64: 128, 128>}, {transform_indices = @transform_2, window_bounds = array<i64: 128, 128>}, {transform_indices = @transform_3, window_bounds = array<i64: 1, 8, 128>}]} {
    %c0 = arith.constant 0 : index
    %c0_0 = arith.constant 0 : index
    %0 = vector.load %arg1[%c0, %c0_0] : memref<128x128xbf16, #tpu.memory_space<vmem>>, vector<128x128xbf16>
    %c0_1 = arith.constant 0 : index
    %c0_2 = arith.constant 0 : index
    %1 = vector.load %arg2[%c0_1, %c0_2] : memref<128x128xbf16, #tpu.memory_space<vmem>>, vector<128x128xbf16>
    %cst = arith.constant dense<0.000000e+00> : vector<128x128xf32>
    %2 = tpu.matmul %0, %1, %cst {dimension_numbers = #tpu.dot_dimension_numbers<[1], [0], [0], [1], [0, 0, 1, 1], [], []>} : vector<128x128xbf16>, vector<128x128xbf16>, vector<128x128xf32> -> vector<128x128xf32>
    %c0_3 = arith.constant 0 : index
    %c0_4 = arith.constant 0 : index
    %3 = vector.load %arg3[%c0_3, %c0_4] : memref<128x128xf32, #tpu.memory_space<vmem>>, vector<128x128xf32>
    tpu.vector_store %arg3[%c0_3, %c0_4], %2 {strides = array<i32>} : memref<128x128xf32, #tpu.memory_space<vmem>>, vector<128x128xf32>,
    %cst_5 = arith.constant dense<0.000000e+00> : vector<128xf32>
    %4 = vector.multi_reduction <add>, %2, %cst_5 [0] : vector<128x128xf32> to vector<128xf32>
    %5 = vector.shape_cast %4 : vector<128xf32> to vector<1x128xf32>
    %6 = arith.mulf %2, %2 : vector<128x128xf32>
    %cst_6 = arith.constant dense<0.000000e+00> : vector<128xf32>
    %7 = vector.multi_reduction <add>, %6, %cst_6 [0] : vector<128x128xf32> to vector<128xf32>
    %8 = vector.shape_cast %7 : vector<128xf32> to vector<1x128xf32>
    %cst_7 = arith.constant 0.000000e+00 : f32
    %9 = vector.broadcast %cst_7 : f32 to vector<6x128xf32>
    %10 = tpu.concatenate %5, %8, %9 in 0 : vector<1x128xf32>, vector<1x128xf32>, vector<6x128xf32> -> vector<8x128xf32>
    %11 = vector.shape_cast %10 : vector<8x128xf32> to vector<1x8x128xf32>
    %c0_8 = arith.constant 0 : index
    %c0_9 = arith.constant 0 : index
    %c0_10 = arith.constant 0 : index
    %12 = vector.load %arg4[%c0_8, %c0_9, %c0_10] : memref<1x8x128xf32, #tpu.memory_space<vmem>>, vector<1x8x128xf32>
    tpu.vector_store %arg4[%c0_8, %c0_9, %c0_10], %11 {strides = array<i32>} : memref<1x8x128xf32, #tpu.memory_space<vmem>>, vector<1x8x128xf32>,
    return
  }
  func.func @transform_0(%arg0: i32) -> (i32, i32) {
    %c0_i32 = arith.constant 0 : i32
    %c0_i32_0 = arith.constant 0 : i32
    return %arg0, %c0_i32 : i32, i32
  }
  func.func @transform_1(%arg0: i32) -> (i32, i32) {
    %c0_i32 = arith.constant 0 : i32
    %c0_i32_0 = arith.constant 0 : i32
    %c0_i32_1 = arith.constant 0 : i32
    return %c0_i32, %c0_i32_0 : i32, i32
  }
  func.func @transform_2(%arg0: i32) -> (i32, i32) {
    %c0_i32 = arith.constant 0 : i32
    %c0_i32_0 = arith.constant 0 : i32
    return %arg0, %c0_i32 : i32, i32
  }
  func.func @transform_3(%arg0: i32) -> (i32, i32, i32) {
    %c0_i32 = arith.constant 0 : i32
    %c0_i32_0 = arith.constant 0 : i32
    %c0_i32_1 = arith.constant 0 : i32
    return %arg0, %c0_i32, %c0_i32_0 : i32, i32, i32
  }
}

</mosaic_0001>

<bundles_post_ra>
// kernel: residual_block_pallas.2
= control target key start
LH: loop header
LB: loop body
LE: loop exit
PB: predicated region body
PF: predicated region fallthrough
CT: control target
= control target key end

     0   :  { %s721_s12 = smov 0   ;;  %s802_s0 = inlined_call_operand.vmem [shape: bf16[512,128], index: 0, kind: input, shape index: {}]   ;;  %s803_s1 = inlined_call_operand.vmem [shape: bf16[128,128], index: 1, kind: input, shape index: {}]   ;;  %s804_s2 = inlined_call_operand.vmem [shape: f32[512,128], index: 2, kind: output, shape index: {0}]   ;;  %s805_s3 = inlined_call_operand.vmem [shape: f32[4,8,128], index: 3, kind: output, shape index: {1}]  }
   0x1 LB: > { %s727_s13 = sadd.s32 4294967295, %s699_s12   ;;  %p581_p0 = scmp.ge.s32.totalorder %s699_s12, 1  ;;  %s699_s12 = sphi %s721_s12, %s14_s12  }
   0x2   : > { %p141_p1 = scmp.lt.s32.totalorder %s699_s12, 5 }
   0x4   : > { %p142_p2 = pnand %p581_p0, %p141_p1 }
   0x5   : > { %s582_s16 = sshll.u32 (!%p142_p2), %s727_s13, 4  ;;  %p181_p4 = scmp.lt.s32.totalorder (!%p142_p2), %s727_s13, 3 }
   0x6   : > { %145 = sbr.rel (%p142_p2) target bundleno = 290 (0x122), region = 28  ;;  %p170_p3 = scmp.lt.s32.totalorder (!%p142_p2), %s582_s16, 63 }
   0xb   : > { %v677_v0 = vld [vmem:[%s803_s1 + $0x38] sm:$0xff]   ;;  %v678_v1 = vld [vmem:[%s803_s1 + $0x30] sm:$0xff]   ;;  %s807_s16 = smov (!%p170_p3, %s582_s16), 63  ;;  %v679_v2 = vld [vmem:[%s803_s1 + $0x28] sm:$0xff]   ;;  %s809_s13 = smov (!%p181_p4, %s727_s13), 3  ;;  %vm485_vm0 = vcmask 1040384  }
   0xc   : > { %621 = vmatprep.subr.bf16.mxu0 %v677_v0  ;;  %653 = vmatprep.subr.bf16.mxu1 %v677_v0  ;;  %s583_s21 = sshll.u32 %s807_s16, 2  ;;  %v680_v3 = vld [vmem:[%s803_s1 + $0x20] sm:$0xff]   ;;  %v681_v5 = vld [vmem:[%s803_s1 + $0x18] sm:$0xff]   ;;  %v682_v7 = vld [vmem:[%s803_s1 + $0x10] sm:$0xff]   ;;  %s585_s8 = sshll.u32 %s807_s16, 3  ;;  %vm487_vm1 = vcmask 1041408  }
   0xd   : > { %622 = vmatpush3.bf16.msra.mxu0 %v677_v0  ;;  %661 = vmatpush3.bf16.msra.mxu1 %v677_v0  ;;  %s747_s24 = scalar_lea.vmem %s802_s0, %s583_s21  ;;  %v683_v8 = vld [vmem:[%s803_s1 + $0x8] sm:$0xff]   ;;  %v684_v9 = vld [vmem:[%s803_s1] sm:$0xff]   ;;  %s776_s11 = scalar_lea.vmem %s804_s2, %s585_s8 }
   0xe   : > { %623 = vmatprep.subr.bf16.mxu0 %v678_v1  ;;  %654 = vmatprep.subr.bf16.mxu1 %v678_v1  ;;  %v685_v4 = vld [vmem:[%s747_s24] sm:$0xff]   ;;  %v686_v10 = vld [vmem:[%s747_s24 + $0x8] sm:$0xff]   ;;  %v687_v12 = vld [vmem:[%s747_s24 + $0x10] sm:$0xff]   ;;  %s586_s14 = sshll.u32 %s809_s13, 3 }
   0xf   : > { %637 = vmatprep.mubr.bf16.mxu0 %v685_v4  ;;  %v689_v6 = vld [vmem:[%s747_s24 + $0x20] sm:$0xff]   ;;  %v690_v11 = vld [vmem:[%s747_s24 + $0x28] sm:$0xff]   ;;  %v691_v13 = vld [vmem:[%s747_s24 + $0x30] sm:$0xff]   ;;  %s184_s17 = scalar_lea.vmem %s805_s3, %s586_s14 }
  0x10   : > { %645 = vmatprep.mubr.bf16.mxu1 %v689_v6  ;;  %v688_v14 = vld [vmem:[%s747_s24 + $0x18] sm:$0xff]  }
  0x11   : > { %624 = vmatpush3.bf16.msra.mxu0 %v678_v1  ;;  %662 = vmatpush3.bf16.msra.mxu1 %v678_v1  ;;  %v692_v15 = vld [vmem:[%s747_s24 + $0x38] sm:$0xff]  }
  0x12   : > { %625 = vmatprep.subr.bf16.mxu0 %v679_v2  ;;  %655 = vmatprep.subr.bf16.mxu1 %v679_v2 }
  0x15   : > { %626 = vmatpush3.bf16.msra.mxu0 %v679_v2  ;;  %663 = vmatpush3.bf16.msra.mxu1 %v679_v2 }
  0x16   : > { %627 = vmatprep.subr.bf16.mxu0 %v680_v3  ;;  %656 = vmatprep.subr.bf16.mxu1 %v680_v3 }
  0x19   : > { %628 = vmatpush3.bf16.msra.mxu0 %v680_v3  ;;  %664 = vmatpush3.bf16.msra.mxu1 %v680_v3 }
  0x1a   : > { %629 = vmatprep.subr.bf16.mxu0 %v681_v5  ;;  %657 = vmatprep.subr.bf16.mxu1 %v681_v5 }
  0x1d   : > { %630 = vmatpush3.bf16.msra.mxu0 %v681_v5  ;;  %665 = vmatpush3.bf16.msra.mxu1 %v681_v5 }
  0x1e   : > { %631 = vmatprep.subr.bf16.mxu0 %v682_v7  ;;  %658 = vmatprep.subr.bf16.mxu1 %v682_v7 }
  0x21   : > { %632 = vmatpush3.bf16.msra.mxu0 %v682_v7  ;;  %666 = vmatpush3.bf16.msra.mxu1 %v682_v7 }
  0x22   : > { %633 = vmatprep.subr.bf16.mxu0 %v683_v8  ;;  %659 = vmatprep.subr.bf16.mxu1 %v683_v8 }
  0x25   : > { %634 = vmatpush3.bf16.msra.mxu0 %v683_v8  ;;  %667 = vmatpush3.bf16.msra.mxu1 %v683_v8 }
  0x26   : > { %635 = vmatprep.subr.bf16.mxu0 %v684_v9  ;;  %660 = vmatprep.subr.bf16.mxu1 %v684_v9 }
  0x29   : > { %636 = vmatpush3.bf16.msra.mxu0 %v684_v9  ;;  %668 = vmatpush3.bf16.msra.mxu1 %v684_v9 }
  0x2c   : > { %638 = vmatmul.mubr.bf16.vlgmr.msra.gmra.mxu0 %v686_v10  ;;  %646 = vmatmul.mubr.bf16.vlgmr.msra.gmra.mxu1 %v690_v11 }
  0x2d   : > { %641 = vmatprep.mubr.bf16.mxu0 %v687_v12  ;;  %649 = vmatprep.mubr.bf16.mxu1 %v691_v13 }
  0x34   : > { %642 = vmatmul.mubr.bf16.gmra.mxu0 %v688_v14  ;;  %650 = vmatmul.mubr.bf16.gmra.mxu1 %v692_v15 }
  0xec   : > { %v639_v16 = vpop.f32.mrf.mxu0  ;;  %v647_v17 = vpop.f32.mrf.mxu1 }
  0xed   : > { %413 = vst [vmem:[%s776_s11 + $0x10] sm:$0xff] %v639_v16  ;;  %421 = vst [vmem:[%s776_s11 + $0x50] sm:$0xff] %v647_v17  ;;  %v450_v29 = vmul.f32 %v639_v16, %v639_v16  ;;  %v458_v59 = vmul.f32 %v647_v17, %v647_v17 }
  0xee   : > { %v348_v18 = vpop.f32.mrf.mxu0  ;;  %v380_v19 = vpop.f32.mrf.mxu1 }
  0xef   : > { %411 = vst [vmem:[%s776_s11] sm:$0xff] %v348_v18  ;;  %419 = vst [vmem:[%s776_s11 + $0x40] sm:$0xff] %v380_v19  ;;  %v448_v24 = vmul.f32 %v348_v18, %v348_v18  ;;  %v456_v53 = vmul.f32 %v380_v19, %v380_v19 }
  0xf0   : > { %v640_v20 = vpop.f32.mrf.mxu0  ;;  %v648_v21 = vpop.f32.mrf.mxu1 }
  0xf1   : > { %414 = vst [vmem:[%s776_s11 + $0x18] sm:$0xff] %v640_v20  ;;  %422 = vst [vmem:[%s776_s11 + $0x58] sm:$0xff] %v648_v21  ;;  %v451_v34 = vmul.f32 %v640_v20, %v640_v20  ;;  %v459_v62 = vmul.f32 %v648_v21, %v648_v21 }
  0xf2   : > { %v351_v22 = vpop.f32.mrf.mxu0  ;;  %v383_v23 = vpop.f32.mrf.mxu1 }
  0xf3   : > { %412 = vst [vmem:[%s776_s11 + $0x8] sm:$0xff] %v351_v22  ;;  %v427_v25 = vadd.f32 %v351_v22, %v348_v18  ;;  %v449_v26 = vmul.f32 %v351_v22, %v351_v22  ;;  %420 = vst [vmem:[%s776_s11 + $0x48] sm:$0xff] %v383_v23  ;;  %v457_v57 = vmul.f32 %v383_v23, %v383_v23 }
  0xf4   : > { %v643_v27 = vpop.f32.mrf.mxu0  ;;  %v651_v28 = vpop.f32.mrf.mxu1 }
  0xf5   : > { %v428_v30 = vadd.f32 %v639_v16, %v427_v25  ;;  %v464_v31 = vadd.f32 %v449_v26, %v448_v24  ;;  %417 = vst [vmem:[%s776_s11 + $0x30] sm:$0xff] %v643_v27  ;;  %425 = vst [vmem:[%s776_s11 + $0x70] sm:$0xff] %v651_v28  ;;  %v454_v47 = vmul.f32 %v643_v27, %v643_v27 }
  0xf6   : > { %v364_v32 = vpop.f32.mrf.mxu0  ;;  %v396_v33 = vpop.f32.mrf.mxu1  ;;  %v462_v7 = vmul.f32 %v651_v28, %v651_v28 }
  0xf7   : > { %v465_v35 = vadd.f32 %v464_v31, %v450_v29  ;;  %415 = vst [vmem:[%s776_s11 + $0x20] sm:$0xff] %v364_v32  ;;  %v429_v36 = vadd.f32 %v640_v20, %v428_v30  ;;  %423 = vst [vmem:[%s776_s11 + $0x60] sm:$0xff] %v396_v33  ;;  %v452_v40 = vmul.f32 %v364_v32, %v364_v32 }
  0xf8   : > { %v644_v37 = vpop.f32.mrf.mxu0  ;;  %v652_v38 = vpop.f32.mrf.mxu1  ;;  %v460_v2 = vmul.f32 %v396_v33, %v396_v33 }
  0xf9   : > { %v430_v39 = vadd.f32 %v429_v36, %v364_v32  ;;  %v466_v41 = vadd.f32 %v465_v35, %v451_v34  ;;  %418 = vst [vmem:[%s776_s11 + $0x38] sm:$0xff] %v644_v37  ;;  %426 = vst [vmem:[%s776_s11 + $0x78] sm:$0xff] %v652_v38  ;;  %v455_v50 = vmul.f32 %v644_v37, %v644_v37 }
  0xfa   : > { %v367_v42 = vpop.f32.mrf.mxu0  ;;  %v399_v43 = vpop.f32.mrf.mxu1  ;;  %v463_v10 = vmul.f32 %v652_v38, %v652_v38 }
  0xfb   : > { %v467_v44 = vadd.f32 %v466_v41, %v452_v40  ;;  %416 = vst [vmem:[%s776_s11 + $0x28] sm:$0xff] %v367_v42  ;;  %v431_v45 = vadd.f32 %v430_v39, %v367_v42  ;;  %v453_v46 = vmul.f32 %v367_v42, %v367_v42  ;;  %424 = vst [vmem:[%s776_s11 + $0x68] sm:$0xff] %v399_v43 }
  0xfc   : > { %v461_v6 = vmul.f32 %v399_v43, %v399_v43 }
  0xfd   : > { %v432_v48 = vadd.f32 %v643_v27, %v431_v45  ;;  %v468_v49 = vadd.f32 %v467_v44, %v453_v46 }
  0xff   : > { %v433_v51 = vadd.f32 %v644_v37, %v432_v48  ;;  %v469_v52 = vadd.f32 %v468_v49, %v454_v47 }
 0x101   : > { %v470_v54 = vadd.f32 %v469_v52, %v455_v50  ;;  %v434_v55 = vadd.f32 %v433_v51, %v380_v19 }
 0x103   : > { %v435_v56 = vadd.f32 %v434_v55, %v383_v23  ;;  %v471_v58 = vadd.f32 %v470_v54, %v456_v53 }
 0x105   : > { %v436_v60 = vadd.f32 %v647_v17, %v435_v56  ;;  %v472_v61 = vadd.f32 %v471_v58, %v457_v57 }
 0x107   : > { %v473_v63 = vadd.f32 %v472_v61, %v458_v59  ;;  %v437_v0 = vadd.f32 %v648_v21, %v436_v60 }
 0x109   : > { %v438_v1 = vadd.f32 %v437_v0, %v396_v33  ;;  %v474_v3 = vadd.f32 %v473_v63, %v459_v62 }
 0x10b   : > { %v475_v4 = vadd.f32 %v474_v3, %v460_v2  ;;  %v439_v5 = vadd.f32 %v438_v1, %v399_v43 }
 0x10d   : > { %v440_v8 = vadd.f32 %v651_v28, %v439_v5  ;;  %v476_v9 = vadd.f32 %v475_v4, %v461_v6 }
 0x10f   : > { %v441_v11 = vadd.f32 %v652_v38, %v440_v8  ;;  %v477_v12 = vadd.f32 %v476_v9, %v462_v7 }
 0x111   : > { %v442_v13 = vrot.slane %v441_v11, 4  ;;  %v478_v14 = vadd.f32 %v477_v12, %v463_v10 }
 0x113   : > { %v443_v15 = vadd.f32 %v442_v13, %v441_v11  ;;  %v479_v16 = vrot.slane %v478_v14, 4 }
 0x115   : > { %v444_v17 = vrot.slane %v443_v15, 2  ;;  %v480_v18 = vadd.f32 %v479_v16, %v478_v14 }
 0x117   : > { %v445_v19 = vadd.f32 %v444_v17, %v443_v15  ;;  %v481_v20 = vrot.slane %v480_v18, 2 }
 0x119   : > { %v446_v21 = vrot.slane %v445_v19, 1  ;;  %v482_v22 = vadd.f32 %v481_v20, %v480_v18 }
 0x11b   : > { %v483_v23 = vrot.slane %v482_v22, 1  ;;  %v447_v24 = vadd.f32 %v446_v21, %v445_v19 }
 0x11d   : > { %v484_v25 = vadd.f32 %v483_v23, %v482_v22 }
 0x11f   : > { %v486_v26 = vsel %vm485_vm0, %v447_v24, %v484_v25 }
 0x120   : > { %v488_v27 = vsel %vm487_vm1, %v486_v26, 0.0 }
 0x121   : > { %489 = vst [vmem:[%s184_s17] sm:$0xff] %v488_v27 }
 0x122 PF: > { %s14_s12 = sadd.s32 1, %s699_s12  }
 0x123   : > { %p11_p5 = scmp.ge.s32.totalorder %s14_s12, 6  }
 0x125   :  { %13 = sbr.rel (!%p11_p5) target bundleno = 1 (0x1), region = 70 }

</bundles_post_ra>
